<compile_context>
chip_gen: v6e
topology: v6e:2x2x1
jax: 0.10.0
libtpu: 0.0.40
codegen_flags: <defaults>
</compile_context>

<pallas_src>
import functools

import jax
import jax.numpy as jnp
from jax.experimental import pallas as pl
from jax.experimental.pallas import tpu as pltpu


def _round_up(x, m):
    return ((x + m - 1) // m) * m


def _vmem_capacity_bytes():
    """Physical VMEM per TensorCore; conservative fallback if unavailable."""
    try:
        cap = getattr(pltpu.get_tpu_info(), "vmem_capacity_bytes", None)
        if cap:
            return int(cap)
    except Exception:
        pass
    return 64 * 1024 * 1024  # v7x-sized fallback (also safe on 128 MiB parts)


def _choose_tiles(B, D, H_pad, x_isz, w_isz, budget, tb_cap):
    """Pick (tb, tk).  tk == D means whole feature dim resident (no K tiling)."""

    def cost(tb, tk):
        # Weight blocks counted TWICE (double-buffer safety), x double-buffered,
        # 3x f32 (tb, H_pad) covers the accumulator scratch + elementwise temps.
        weights = 2 * tk * H_pad * w_isz + 2 * 2 * H_pad * 4
        stream = 2 * tb * tk * x_isz + 2 * tb * 4
        scratch = 3 * tb * H_pad * 4
        return weights + stream + scratch

    B8 = _round_up(B, 8)
    if B8 <= 128:
        # Tiny batch: one tile (tb == B_pad keeps the lane-dense output legal).
        tb_candidates = [B8]
    else:
        # Multiples of 128; aim for >= 2-4 grid steps (pipelining + megacore).
        top = min(tb_cap, max(128, ((B8 // 4) // 128) * 128))
        tb_candidates = []
        t = top
        while t >= 128:
            tb_candidates.append(t)
            t //= 2
        if tb_candidates[-1] != 128:
            tb_candidates.append(128)

    # Prefer full-D residency: w1 loaded once, no K streaming.
    for tb in tb_candidates:
        if cost(tb, D) <= budget:
            return tb, D
    # Fall back to K-tiling over the feature dim (tk a multiple of 128).
    for tb in tb_candidates:
        for tk in (2048, 1024, 512, 256, 128):
            if tk <= _round_up(D, 128) and cost(tb, tk) <= budget:
                return tb, tk
    return tb_candidates[-1], 128


def _coxnnet_kernel(x_ref, w1_ref, bw_ref, o_ref, acc_ref):
    k = pl.program_id(1)

    @pl.when(k == 0)
    def _():
        acc_ref[...] = jnp.zeros_like(acc_ref)

    # fc1 partial product on the MXU, f32 accumulation (no in-kernel astype:
    # the wrapper already matches the x / w1 dtypes).
    acc_ref[...] += jnp.dot(x_ref[...], w1_ref[...],
                            preferred_element_type=jnp.float32)

    @pl.when(k == pl.num_programs(1) - 1)
    def _():
        # bias + tanh (VPU / EUP); fc2 (N=1, no bias) as a VPU multiply against
        # the lane-dense w2 row (row 1 of bw) + XLU lane reduction -- the MXU
        # is only used for fc1.
        h = jnp.tanh(acc_ref[...] + bw_ref[0:1, :])          # (tb, H_pad) f32
        score = jnp.sum(h * bw_ref[1:2, :], axis=-1)          # (tb,)
        o_ref[...] = score[None, :].astype(o_ref.dtype)       # lane-dense (1, tb)


@functools.partial(jax.jit, static_argnames=("tb", "tk", "use_bf16_matmul"))
def coxnnet_forward(x, w1, b1, w2, *, tb=None, tk=None, use_bf16_matmul=True):
    """x:(B,D)  w1:(D,H)  b1:(1,H) or (H,)  w2:(H,1) or (H,)  ->  (B,1)."""
    B, D = x.shape
    H = w1.shape[1]
    assert w1.shape == (D, H)
    b1 = b1.reshape(1, H)
    w2 = w2.reshape(H, 1)
    out_dtype = x.dtype

    # --- pad hidden dim to a lane-full multiple of 128 (padded columns are
    #     inert: tanh(0 + 0) * 0 contributes nothing to the Cox score) -------
    H_pad = max(128, _round_up(H, 128))
    if H_pad != H:
        w1 = jnp.pad(w1, ((0, 0), (0, H_pad - H)))
        b1 = jnp.pad(b1, ((0, 0), (0, H_pad - H)))
        w2 = jnp.pad(w2, ((0, H_pad - H), (0, 0)))
    # Fold bias + w2 into a single f32 (2, H_pad) operand: row 0 = b1, row 1 = w2^T.
    bw = jnp.concatenate(
        [b1.astype(jnp.float32), w2.astype(jnp.float32).reshape(1, H_pad)], axis=0)

    # --- bf16 by default on the dominant x / w1 HBM streams (f32 accumulate) -
    if use_bf16_matmul:
        x_in = x.astype(jnp.bfloat16)
        w1_in = w1.astype(jnp.bfloat16)
    else:
        x_in = x.astype(jnp.float32)
        w1_in = w1.astype(jnp.float32)

    # --- generation-aware VMEM budget / tile selection ----------------------
    vmem_cap = _vmem_capacity_bytes()
    budget = int(vmem_cap * 0.6)          # ~38 MiB on v7x, ~76 MiB on v5e/v6e
    vmem_limit = int(vmem_cap * 0.75)     # scoped limit: ~48 MiB / ~96 MiB
    tb_cap = 512 if vmem_cap <= 64 * 1024 * 1024 else 1024

    tb_auto, tk_auto = _choose_tiles(B, D, H_pad, x_in.dtype.itemsize,
                                     w1_in.dtype.itemsize, budget, tb_cap)
    if tb is None:
        tb = tb_auto
    else:
        tb = max(8, _round_up(int(tb), 8))
        if tb < _round_up(B, 8):
            # Multi-tile batch: lane-dense (1, tb) output blocks need tb % 128 == 0.
            tb = max(128, _round_up(tb, 128))
    if tk is None:
        tk = tk_auto
    else:
        tk = int(tk)
        if tk < D:
            tk = max(128, _round_up(tk, 128))

    # --- pad batch / feature dims to the tile grid ---------------------------
    B_pad = _round_up(B, tb)
    if tk >= D:
        tk = D
        D_pad = D
    else:
        D_pad = _round_up(D, tk)
    if B_pad != B or D_pad != D:
        x_in = jnp.pad(x_in, ((0, B_pad - B), (0, D_pad - D)))
    if D_pad != D:
        w1_in = jnp.pad(w1_in, ((0, D_pad - D), (0, 0)))

    gb = B_pad // tb
    gk = D_pad // tk

    cost = pl.CostEstimate(
        flops=2 * B_pad * D_pad * H_pad + 3 * B_pad * H_pad,
        transcendentals=B_pad * H_pad,
        bytes_accessed=(B_pad * D_pad * x_in.dtype.itemsize
                        + D_pad * H_pad * w1_in.dtype.itemsize * (gb if gk > 1 else 1)
                        + 2 * H_pad * 4
                        + B_pad * x.dtype.itemsize),
    )

    out_row = pl.pallas_call(
        _coxnnet_kernel,
        out_shape=jax.ShapeDtypeStruct((1, B_pad), out_dtype),
        grid_spec=pltpu.PrefetchScalarGridSpec(
            num_scalar_prefetch=0,
            grid=(gb, gk),
            in_specs=[
                # x: streamed per (batch, K) tile, auto double-buffered.
                pl.BlockSpec((tb, tk), lambda i, k: (i, k)),
                # w1: per-K tile; with gk == 1 the block index is constant so
                # it is fetched once and stays VMEM-resident across the grid.
                pl.BlockSpec((tk, H_pad), lambda i, k: (k, 0)),
                # folded (b1; w2) rows: constant block, VMEM-resident.
                pl.BlockSpec((2, H_pad), lambda i, k: (0, 0)),
            ],
            out_specs=pl.BlockSpec((1, tb), lambda i, k: (0, i)),
            scratch_shapes=[pltpu.VMEM((tb, H_pad), jnp.float32)],
        ),
        compiler_params=pltpu.CompilerParams(
            dimension_semantics=("parallel", "arbitrary"),
            vmem_limit_bytes=vmem_limit,
        ),
        cost_estimate=cost,
    )(x_in, w1_in, bw)

    return out_row[0, :B].reshape(B, 1)


def init_params(key, input_dim, n_hidden, dtype=jnp.float32):
    """Deterministic init mimicking PyTorch Linear default U[-1/sqrt(fan_in), +...]."""
    k1, k2, k3 = jax.random.split(key, 3)
    bound1 = 1.0 / (input_dim ** 0.5)
    bound2 = 1.0 / (n_hidden ** 0.5)
    w1 = jax.random.uniform(k1, (input_dim, n_hidden), dtype, -bound1, bound1)
    b1 = jax.random.uniform(k2, (1, n_hidden), dtype, -bound1, bound1)
    w2 = jax.random.uniform(k3, (n_hidden, 1), dtype, -bound2, bound2)
    return w1, b1, w2


if __name__ == "__main__":
    key = jax.random.PRNGKey(0)
    kx, kp, kx2, kp2 = jax.random.split(key, 4)

    def ref_forward(x, w1, b1, w2):
        # Same math as the PyTorch module forward (dropout is not applied there).
        return jnp.tanh(x @ w1 + b1.reshape(1, -1)) @ w2.reshape(-1, 1)

    # --- small config consistent with the module ----------------------------
    batch, input_dim, n_hidden = 8, 16, 32
    x = jax.random.normal(kx, (batch, input_dim), jnp.float32)
    w1, b1, w2 = init_params(kp, input_dim, n_hidden)
    ref = ref_forward(x, w1, b1, w2)

    out_f32 = jax.block_until_ready(
        coxnnet_forward(x, w1, b1, w2, use_bf16_matmul=False))
    assert out_f32.shape == (batch, 1)
    assert jnp.allclose(out_f32, ref, atol=1e-5, rtol=1e-5)

    out_bf16 = jax.block_until_ready(coxnnet_forward(x, w1, b1, w2))  # default bf16
    assert out_bf16.shape == (batch, 1)
    assert jnp.allclose(out_bf16, ref, atol=3e-2, rtol=3e-2)

    # --- exercise the multi-batch-tile + K-tiled reduction paths ------------
    batch2, input_dim2, n_hidden2 = 300, 272, 40
    x2 = jax.random.normal(kx2, (batch2, input_dim2), jnp.float32)
    w1b, b1b, w2b = init_params(kp2, input_dim2, n_hidden2)
    ref2 = ref_forward(x2, w1b, b1b, w2b)
    out2 = jax.block_until_ready(
        coxnnet_forward(x2, w1b, b1b, w2b, use_bf16_matmul=False, tb=64, tk=128))
    assert out2.shape == (batch2, 1)
    assert jnp.allclose(out2, ref2, atol=1e-4, rtol=1e-4)

    print("KERNEL_OK")
</pallas_src>

<mosaic_0001>
module attributes {stable_mosaic.version = 11 : i64} {
  func.func @_coxnnet_kernel(%arg0: i32, %arg1: i32, %arg2: memref<8x16xf32, #tpu.memory_space<vmem>>, %arg3: memref<16x128xf32, #tpu.memory_space<vmem>>, %arg4: memref<2x128xf32, #tpu.memory_space<vmem>>, %arg5: memref<1x8xf32, #tpu.memory_space<vmem>>, %arg6: memref<8x128xf32, #tpu.memory_space<vmem>>) attributes {dimension_semantics = [#tpu.dimension_semantics<parallel>, #tpu.dimension_semantics<arbitrary>], iteration_bounds = array<i64: 1, 1>, scalar_prefetch = 0 : i64, scratch_operands = 1 : i64, tpu.core_type = #tpu.core_type<tc>, window_params = [{transform_indices = @transform_0, window_bounds = array<i64: 8, 16>}, {transform_indices = @transform_1, window_bounds = array<i64: 16, 128>}, {pipeline_mode = #tpu.pipeline_mode<synchronous>, transform_indices = @transform_2, window_bounds = array<i64: 2, 128>}, {transform_indices = @transform_3, window_bounds = array<i64: 1, 8>}]} {
    %c0_i32 = arith.constant 0 : i32
    %0 = arith.cmpi eq, %arg1, %c0_i32 : i32
    %1 = arith.extui %0 : i1 to i32
    %c0_i32_0 = arith.constant 0 : i32
    %2 = arith.cmpi ne, %1, %c0_i32_0 : i32
    scf.if %2 {
      %cst_10 = arith.constant 0.000000e+00 : f32
      %12 = vector.broadcast %cst_10 : f32 to vector<8x128xf32>
      %c0_11 = arith.constant 0 : index
      %c0_12 = arith.constant 0 : index
      %13 = vector.load %arg6[%c0_11, %c0_12] : memref<8x128xf32, #tpu.memory_space<vmem>>, vector<8x128xf32>
      tpu.vector_store %arg6[%c0_11, %c0_12], %12 {strides = array<i32>} : memref<8x128xf32, #tpu.memory_space<vmem>>, vector<8x128xf32>,
    } else {
    }
    %c0 = arith.constant 0 : index
    %c0_1 = arith.constant 0 : index
    %3 = vector.load %arg6[%c0, %c0_1] : memref<8x128xf32, #tpu.memory_space<vmem>>, vector<8x128xf32>
    %c0_2 = arith.constant 0 : index
    %c0_3 = arith.constant 0 : index
    %4 = vector.load %arg2[%c0_2, %c0_3] : memref<8x16xf32, #tpu.memory_space<vmem>>, vector<8x16xf32>
    %c0_4 = arith.constant 0 : index
    %c0_5 = arith.constant 0 : index
    %5 = vector.load %arg3[%c0_4, %c0_5] : memref<16x128xf32, #tpu.memory_space<vmem>>, vector<16x128xf32>
    %cst = arith.constant dense<0.000000e+00> : vector<8x128xf32>
    %6 = tpu.matmul %4, %5, %cst {dimension_numbers = #tpu.dot_dimension_numbers<[1], [0], [0], [1], [0, 0, 1, 1], [], []>} : vector<8x16xf32>, vector<16x128xf32>, vector<8x128xf32> -> vector<8x128xf32>
    %7 = arith.addf %3, %6 : vector<8x128xf32>
    %c0_6 = arith.constant 0 : index
    %c0_7 = arith.constant 0 : index
    %8 = vector.load %arg6[%c0_6, %c0_7] : memref<8x128xf32, #tpu.memory_space<vmem>>, vector<8x128xf32>
    tpu.vector_store %arg6[%c0_6, %c0_7], %7 {strides = array<i32>} : memref<8x128xf32, #tpu.memory_space<vmem>>, vector<8x128xf32>,
    %c0_i32_8 = arith.constant 0 : i32
    %9 = arith.cmpi eq, %arg1, %c0_i32_8 : i32
    %10 = arith.extui %9 : i1 to i32
    %c0_i32_9 = arith.constant 0 : i32
    %11 = arith.cmpi ne, %10, %c0_i32_9 : i32
    scf.if %11 {
      %c0_10 = arith.constant 0 : index
      %c0_11 = arith.constant 0 : index
      %12 = vector.load %arg6[%c0_10, %c0_11] : memref<8x128xf32, #tpu.memory_space<vmem>>, vector<8x128xf32>
      %c0_12 = arith.constant 0 : index
      %c0_13 = arith.constant 0 : index
      %13 = vector.load %arg4[%c0_12, %c0_13] : memref<2x128xf32, #tpu.memory_space<vmem>>, vector<1x128xf32>
      %14 = vector.broadcast %13 : vector<1x128xf32> to vector<8x128xf32>
      %15 = arith.addf %12, %14 : vector<8x128xf32>
      %16 = math.tanh %15 : vector<8x128xf32>
      %c1 = arith.constant 1 : index
      %c0_14 = arith.constant 0 : index
      %17 = vector.load %arg4[%c1, %c0_14] : memref<2x128xf32, #tpu.memory_space<vmem>>, vector<1x128xf32>
      %18 = vector.broadcast %17 : vector<1x128xf32> to vector<8x128xf32>
      %19 = arith.mulf %16, %18 : vector<8x128xf32>
      %cst_15 = arith.constant dense<0.000000e+00> : vector<8xf32>
      %20 = vector.multi_reduction <add>, %19, %cst_15 [1] : vector<8x128xf32> to vector<8xf32>
      %21 = vector.shape_cast %20 : vector<8xf32> to vector<1x8xf32>
      %c0_16 = arith.constant 0 : index
      %c0_17 = arith.constant 0 : index
      %22 = vector.load %arg5[%c0_16, %c0_17] : memref<1x8xf32, #tpu.memory_space<vmem>>, vector<1x8xf32>
      tpu.vector_store %arg5[%c0_16, %c0_17], %21 {strides = array<i32>} : memref<1x8xf32, #tpu.memory_space<vmem>>, vector<1x8xf32>,
    } else {
    }
    return
  }
  func.func @transform_0(%arg0: i32, %arg1: i32) -> (i32, i32) {
    %c0_i32 = arith.constant 0 : i32
    return %arg0, %arg1 : i32, i32
  }
  func.func @transform_1(%arg0: i32, %arg1: i32) -> (i32, i32) {
    %c0_i32 = arith.constant 0 : i32
    %c0_i32_0 = arith.constant 0 : i32
    return %arg1, %c0_i32 : i32, i32
  }
  func.func @transform_2(%arg0: i32, %arg1: i32) -> (i32, i32) {
    %c0_i32 = arith.constant 0 : i32
    %c0_i32_0 = arith.constant 0 : i32
    %c0_i32_1 = arith.constant 0 : i32
    return %c0_i32, %c0_i32_0 : i32, i32
  }
  func.func @transform_3(%arg0: i32, %arg1: i32) -> (i32, i32) {
    %c0_i32 = arith.constant 0 : i32
    %c0_i32_0 = arith.constant 0 : i32
    return %c0_i32, %arg0 : i32, i32
  }
}

</mosaic_0001>

<bundles_post_ra>
// kernel: coxnnet_forward.1
= control target key start
LH: loop header
LB: loop body
LE: loop exit
PB: predicated region body
PF: predicated region fallthrough
CT: control target
= control target key end

     0   :  { %v183_v1 = vmov 0.0   ;;  %vm184_vm0 = vmmov 0   ;;  %s224_s0 = inlined_call_operand.vmem [shape: f32[8,16], index: 0, kind: input, shape index: {}]   ;;  %s225_s1 = inlined_call_operand.vmem [shape: f32[16,128], index: 1, kind: input, shape index: {}]   ;;  %s226_s2 = inlined_call_operand.vmem [shape: f32[2,128], index: 2, kind: input, shape index: {}]   ;;  %s227_s3 = inlined_call_operand.hbm [shape: f32[1,8], index: 3, kind: output, shape index: {}]  }
   0x1   :  { %v23_v0 = vld [vmem:[%s225_s1 + $0x8] sm:$0xff]  ;;  %149 = vmatprep.subr.mxu0 %v183_v1  ;;  %v22_v2 = vld [vmem:[%s225_s1] sm:$0xff]  ;;  %153 = vmatprep.mubr.msk.f32.mxu0 %vm184_vm0, %v183_v1 }
   0x2   :  { %8 = vsyncpa [#allocation4], 0  ;;  %150 = vmatpush3.msra.mxu0 %v23_v0  ;;  %v21_v3 = vld [vmem:[%s224_s0] sm:$0xff]  ;;  %vm24_vm1 = vcmask 130048   ;;  %v120_v11 = vlaneseq  ;;  %s185_s0 = smov [#allocation3]   ;;  %vm127_vm2 = vcmask 57344  }
   0x3   :  { %151 = vmatprep.subr.mxu0 %v183_v1  ;;  %v144_v4 = vld [vmem:[%s226_s2] ss:$0 sm:$0xff]  ;;  %v145_v8 = vld [vmem:[%s226_s2 + $0x1] ss:$0 sm:$0xff]  ;;  %s135_s21 = sshll.u32 %s185_s0, 4  ;;  %s136_s21 = int_to_ptr.vmem [resolvable:$true] %s135_s21 }
   0x4   :  { %152 = vmatpush3.msra.mxu0 %v22_v2  ;;  %v121_v12 = vand.u32 127, %v120_v11  ;;  %v123_v13 = vshrl.u32 %v120_v11, 7  ;;  %s161_s22 = scalar_lea.vmem %s136_s21, 16  ;;  %s165_s23 = scalar_lea.vmem %s136_s21, 32 }
   0x5   :  { %154 = vmatmul.mubr.msk.f32.vlgmr.msra.gmra.mxu0 %vm24_vm1, %v21_v3  ;;  %p162_p0 = scmp.ne.s32.totalorder %s136_s21, %s161_s22  ;;  %p166_p1 = scmp.lt.s32.totalorder %s136_s21, %s136_s21 }
   0x6   :  { %v124_v14 = vsub.s32 %v121_v12, %v123_v13  ;;  %p167_p2 = scmp.lt.s32.totalorder %s165_s23, %s161_s22 }
   0x8   :  { %p168_p3 = por %p167_p2, %p166_p1 }
   0xa   :  { %p169_p4 = pnand %p168_p3, %p162_p0 }
  0xc5   :  { %v94_v5 = vpop.f32.mrf.mxu0 }
  0xc6   :  { %v109_v6 = vadd.f32 %v144_v4, %v94_v5 }
  0xc7   :  { %v155_v7 = vpop.f32.mrf.mxu0 }
  0xc8   :  { %159 = vtanh.f32 %v109_v6 }
  0xd5   :  { %v160_v9 = vpop.eup %159 }
  0xd6   :  { %v116_v10 = vmul.f32 %v160_v9, %v145_v8 }
  0xd8   :  { %117 = vadd.xlane.f32.xlu0 %v116_v10 }
 0x161   :  { %v118_v15 = vpop.xlane.xlu0 %117 }
 0x162   :  { %v125_v16 = vrot.slane %v118_v15, %v124_v14 }
 0x164   :  { %128 = vst.msk [vmem:[#allocation3] sm:$0x1] %vm127_vm2, %v125_v16 }
 0x165   :  { %172 = shalt.err (!%p169_p4)
}
 0x166   :  { %138 = dma.vmem_to_hbm [thread:$0]  %s136_s21, 16, %s227_s3, [#allocation4]  }
 0x167   :  { %181 = dma.done.wait [#allocation4], 16  }
 0x168   :  { %182 = vsyncadd [#allocation4], 4294967280 }
 0x169   :  { %142 = vsyncpa [#allocation4], 1 }

</bundles_post_ra>
